<compile_context>
chip_gen: v6e
topology: v6e:2x2x1
jax: 0.10.0
libtpu: 0.0.40
codegen_flags: <defaults>
</compile_context>

<pallas_src>
import jax
import jax.numpy as jnp
from jax import lax
from jax.experimental import pallas as pl
from jax.experimental.pallas import tpu as pltpu


# Tiny epsilon inside the L2-norm rsqrt: the original l2_norm has no eps and
# produces Inf/NaN for an all-zero channel column; 1e-12 is numerically
# invisible for normal activations but keeps the kernel robust.
_NORM_EPS = 1e-12


def _round_up(x, m):
    return ((x + m - 1) // m) * m


# ---------------------------------------------------------------------------
# pass 1: per-batch reduction over spatial tiles -> k_sum, v_sum, matrix
# ---------------------------------------------------------------------------
def _stats_kernel(n_valid, n_pad, tile_n):
    def kernel(x_ref, wk_ref, bk_ref, wv_ref, bv_ref,
               ksum_ref, vsum_ref, mat_ref):
        t = pl.program_id(1)

        @pl.when(t == 0)
        def _():
            ksum_ref[...] = jnp.zeros_like(ksum_ref)
            vsum_ref[...] = jnp.zeros_like(vsum_ref)
            mat_ref[...] = jnp.zeros_like(mat_ref)

        xb = x_ref[0]                                            # (C, TN) bf16

        # 1x1 convs == channel-mixing matmuls; bf16 MXU, f32 accumulation.
        V = jnp.dot(wv_ref[...], xb,
                    preferred_element_type=jnp.float32) + bv_ref[...]   # (C,  TN)
        K = jnp.dot(wk_ref[...], xb,
                    preferred_element_type=jnp.float32) + bk_ref[...]   # (Ck, TN)

        # per-spatial-column l2 normalization over channels (EUP rsqrt).
        Kn = K * lax.rsqrt(jnp.sum(K * K, axis=0, keepdims=True) + _NORM_EPS)

        if n_pad != n_valid:   # static: mask zero-padded spatial columns
            col = t * tile_n + lax.broadcasted_iota(jnp.int32, (1, tile_n), 1)
            valid = col < n_valid
            Kn = jnp.where(valid, Kn, 0.0)
            V = jnp.where(valid, V, 0.0)

        vsum_ref[0] += jnp.sum(V, axis=1, keepdims=True)          # (C, 1)
        ksum_ref[0] += jnp.sum(Kn, axis=1, keepdims=True)         # (Ck, 1)
        # matrix += einsum('mn,cn->mc', Kn, V) -- contraction on the last axes,
        # no materialized V.T.
        mat_ref[0] += lax.dot_general(
            Kn, V, (((1,), (1,)), ((), ())),
            preferred_element_type=jnp.float32)                   # (Ck, C)
    return kernel


# ---------------------------------------------------------------------------
# pass 2: re-sweep spatial tiles -> Q, tailor, output tile
# ---------------------------------------------------------------------------
def _apply_kernel(n_valid):
    def kernel(x_ref, wq_ref, bq_ref, ksum_ref, vsum_ref, mat_ref, gamma_ref,
               out_ref):
        xb = x_ref[0]                                            # (C, TN) bf16

        Q = jnp.dot(wq_ref[...], xb,
                    preferred_element_type=jnp.float32) + bq_ref[...]   # (Ck, TN)
        Qn = Q * lax.rsqrt(jnp.sum(Q * Q, axis=0, keepdims=True) + _NORM_EPS)

        # denom = N + (k_sum + eps)^T @ Qn      -> (1, TN), no transpose copy
        denom = float(n_valid) + lax.dot_general(
            ksum_ref[0], Qn, (((0,), (0,)), ((), ())),
            preferred_element_type=jnp.float32)
        tailor = pl.reciprocal(denom, approx=True)               # EUP

        # qm = matrix^T @ Qn                    -> (C, TN)
        qm = lax.dot_general(
            mat_ref[0], Qn, (((0,), (0,)), ((), ())),
            preferred_element_type=jnp.float32)

        weight_value = (vsum_ref[0] + qm) * tailor               # (C, TN)
        out_ref[0] = xb.astype(jnp.float32) + gamma_ref[0] * weight_value
    return kernel


# ---------------------------------------------------------------------------
# wrapper
# ---------------------------------------------------------------------------
def pam_module_pallas(x, wq, bq, wk, bk, wv, bv, gamma, eps=1e-6, tile_n=512):
    """x: (B, C, H, W) f32; wq/wk: (Ck, C); wv: (C, C); biases 1-D; gamma scalar."""
    B, C, H, W = x.shape
    assert H == W, "original module's view() semantics require square spatial dims"
    N = H * W
    Ck = wq.shape[0]

    assert tile_n % 128 == 0
    TN = min(tile_n, _round_up(N, 128))          # lane-dense spatial tile
    n_pad = _round_up(N, TN)
    n_tiles = n_pad // TN

    # bf16 activations / weights for the MXU (f32 accumulation in-kernel);
    # also halves HBM->VMEM DMA over the two sweeps of x.
    x_flat = x.reshape(B, C, N)
    if n_pad != N:
        x_flat = jnp.pad(x_flat, ((0, 0), (0, 0), (0, n_pad - N)))
    x_bf = x_flat.astype(jnp.bfloat16)
    wq_b = wq.astype(jnp.bfloat16)
    wk_b = wk.astype(jnp.bfloat16)
    wv_b = wv.astype(jnp.bfloat16)
    bq2 = bq.reshape(Ck, 1).astype(jnp.float32)
    bk2 = bk.reshape(Ck, 1).astype(jnp.float32)
    bv2 = bv.reshape(C, 1).astype(jnp.float32)
    gamma1 = jnp.asarray(gamma, jnp.float32).reshape(1)

    const = lambda b, t: (0, 0)
    # NOTE: for very large C the constant-index weight specs could additionally
    # be single-buffered (pipeline_mode=pl.Buffered(1)) to save VMEM on v7x.

    # ---- pass 1: stats reduction --------------------------------------------
    k_sum, v_sum, matrix = pl.pallas_call(
        _stats_kernel(N, n_pad, TN),
        out_shape=(
            jax.ShapeDtypeStruct((B, Ck, 1), jnp.float32),
            jax.ShapeDtypeStruct((B, C, 1), jnp.float32),
            jax.ShapeDtypeStruct((B, Ck, C), jnp.float32),
        ),
        grid_spec=pltpu.PrefetchScalarGridSpec(
            num_scalar_prefetch=0,
            grid=(B, n_tiles),
            in_specs=[
                pl.BlockSpec((1, C, TN), lambda b, t: (b, 0, t)),   # x
                pl.BlockSpec((Ck, C), const),                       # Wk
                pl.BlockSpec((Ck, 1), const),                       # bk
                pl.BlockSpec((C, C), const),                        # Wv
                pl.BlockSpec((C, 1), const),                        # bv
            ],
            out_specs=(
                pl.BlockSpec((1, Ck, 1), lambda b, t: (b, 0, 0)),   # k_sum
                pl.BlockSpec((1, C, 1), lambda b, t: (b, 0, 0)),    # v_sum
                pl.BlockSpec((1, Ck, C), lambda b, t: (b, 0, 0)),   # matrix
            ),
        ),
        compiler_params=pltpu.CompilerParams(
            dimension_semantics=("parallel", "arbitrary")),
    )(x_bf, wk_b, bk2, wv_b, bv2)

    # eps of the original tailor_sum is added to the per-channel K sums here.
    k_sum_eps = k_sum + jnp.float32(eps)

    # ---- pass 2: apply -------------------------------------------------------
    out_flat = pl.pallas_call(
        _apply_kernel(N),
        out_shape=jax.ShapeDtypeStruct((B, C, n_pad), jnp.float32),
        grid_spec=pltpu.PrefetchScalarGridSpec(
            num_scalar_prefetch=0,
            grid=(B, n_tiles),
            in_specs=[
                pl.BlockSpec((1, C, TN), lambda b, t: (b, 0, t)),   # x
                pl.BlockSpec((Ck, C), const),                       # Wq
                pl.BlockSpec((Ck, 1), const),                       # bq
                pl.BlockSpec((1, Ck, 1), lambda b, t: (b, 0, 0)),   # k_sum + eps
                pl.BlockSpec((1, C, 1), lambda b, t: (b, 0, 0)),    # v_sum
                pl.BlockSpec((1, Ck, C), lambda b, t: (b, 0, 0)),   # matrix
                pl.BlockSpec(memory_space=pltpu.MemorySpace.SMEM),  # gamma
            ],
            out_specs=pl.BlockSpec((1, C, TN), lambda b, t: (b, 0, t)),
        ),
        compiler_params=pltpu.CompilerParams(
            dimension_semantics=("parallel", "parallel")),
    )(x_bf, wq_b, bq2, k_sum_eps, v_sum, matrix, gamma1)

    if n_pad != N:
        out_flat = out_flat[:, :, :N]
    return out_flat.reshape(B, C, H, W)


# ---------------------------------------------------------------------------
# pure-JAX reference (mirror of the PyTorch forward) for validation
# ---------------------------------------------------------------------------
def pam_module_reference(x, wq, bq, wk, bk, wv, bv, gamma, eps=1e-6):
    B, C, H, W = x.shape
    N = H * W
    hi = lax.Precision.HIGHEST
    xf = x.reshape(B, C, N)
    Q = jnp.einsum('oc,bcn->bon', wq, xf, precision=hi) + bq[None, :, None]
    K = jnp.einsum('oc,bcn->bon', wk, xf, precision=hi) + bk[None, :, None]
    V = jnp.einsum('oc,bcn->bon', wv, xf, precision=hi) + bv[None, :, None]
    Qn = Q / jnp.linalg.norm(Q, axis=1, keepdims=True)
    Kn = K / jnp.linalg.norm(K, axis=1, keepdims=True)
    Qp = jnp.transpose(Qn, (0, 2, 1))                                   # (B, N, Ck)
    tailor = 1.0 / (N + jnp.einsum('bnc,bc->bn', Qp,
                                   jnp.sum(Kn, -1) + eps, precision=hi))
    v_sum = jnp.sum(V, -1)[:, :, None]                                  # (B, C, 1)
    matrix = jnp.einsum('bmn,bcn->bmc', Kn, V, precision=hi)            # (B, Ck, C)
    ms = v_sum + jnp.einsum('bnm,bmc->bcn', Qp, matrix, precision=hi)   # (B, C, N)
    wval = ms * tailor[:, None, :]
    return (xf + gamma * wval).reshape(B, C, H, W)


if __name__ == "__main__":
    B, C = 2, 32
    scale = 8
    Ck = C // scale
    eps = 1e-6

    key = jax.random.PRNGKey(0)
    kx, kq, kbq, kk, kbk, kv, kbv, kx2 = jax.random.split(key, 8)

    wq = jax.random.normal(kq, (Ck, C), jnp.float32) * 0.1
    bq = jax.random.normal(kbq, (Ck,), jnp.float32) * 0.1
    wk = jax.random.normal(kk, (Ck, C), jnp.float32) * 0.1
    bk = jax.random.normal(kbk, (Ck,), jnp.float32) * 0.1
    wv = jax.random.normal(kv, (C, C), jnp.float32) * 0.1
    bv = jax.random.normal(kbv, (C,), jnp.float32) * 0.1
    # Module __init__ uses gamma = 0 (which would make out == x); use a nonzero
    # deterministic value so the attention path is actually exercised.
    gamma = jnp.float32(0.5)

    # reference is evaluated on the same bf16-rounded activations/weights the
    # kernel feeds to the MXU; remaining delta is accumulation order + the
    # approximate EUP reciprocal, well under 1e-2.
    r = lambda a: a.astype(jnp.bfloat16).astype(jnp.float32)

    def check(H, W):
        x = jax.random.normal(kx if H == 16 else kx2, (B, C, H, W), jnp.float32)
        out = jax.block_until_ready(
            pam_module_pallas(x, wq, bq, wk, bk, wv, bv, gamma, eps))
        ref = pam_module_reference(r(x), r(wq), bq, r(wk), bk, r(wv), bv, gamma, eps)
        assert out.shape == (B, C, H, W)
        err = float(jnp.max(jnp.abs(out - ref)))
        assert err < 1e-2, err

    check(16, 16)   # N = 256 (lane-aligned, no padding)
    check(10, 10)   # N = 100 (exercises the pad-to-128 + mask path)

    print("KERNEL_OK")
</pallas_src>

<mosaic_0001>
module attributes {stable_mosaic.version = 11 : i64} {
  func.func @kernel(%arg0: i32, %arg1: i32, %arg2: memref<1x32x256xbf16, #tpu.memory_space<vmem>>, %arg3: memref<4x32xbf16, #tpu.memory_space<vmem>>, %arg4: memref<4x1xf32, #tpu.memory_space<vmem>>, %arg5: memref<32x32xbf16, #tpu.memory_space<vmem>>, %arg6: memref<32x1xf32, #tpu.memory_space<vmem>>, %arg7: memref<1x4x1xf32, #tpu.memory_space<vmem>>, %arg8: memref<1x32x1xf32, #tpu.memory_space<vmem>>, %arg9: memref<1x4x32xf32, #tpu.memory_space<vmem>>) attributes {dimension_semantics = [#tpu.dimension_semantics<parallel>, #tpu.dimension_semantics<arbitrary>], iteration_bounds = array<i64: 2, 1>, scalar_prefetch = 0 : i64, scratch_operands = 0 : i64, tpu.core_type = #tpu.core_type<tc>, window_params = [{transform_indices = @transform_0, window_bounds = array<i64: 1, 32, 256>}, {pipeline_mode = #tpu.pipeline_mode<synchronous>, transform_indices = @transform_1, window_bounds = array<i64: 4, 32>}, {pipeline_mode = #tpu.pipeline_mode<synchronous>, transform_indices = @transform_2, window_bounds = array<i64: 4, 1>}, {pipeline_mode = #tpu.pipeline_mode<synchronous>, transform_indices = @transform_3, window_bounds = array<i64: 32, 32>}, {pipeline_mode = #tpu.pipeline_mode<synchronous>, transform_indices = @transform_4, window_bounds = array<i64: 32, 1>}, {transform_indices = @transform_5, window_bounds = array<i64: 1, 4, 1>}, {transform_indices = @transform_6, window_bounds = array<i64: 1, 32, 1>}, {transform_indices = @transform_7, window_bounds = array<i64: 1, 4, 32>}]} {
    %c0_i32 = arith.constant 0 : i32
    %0 = arith.cmpi eq, %arg1, %c0_i32 : i32
    %1 = arith.extui %0 : i1 to i32
    %c0_i32_0 = arith.constant 0 : i32
    %2 = arith.cmpi ne, %1, %c0_i32_0 : i32
    scf.if %2 {
      %cst_35 = arith.constant 0.000000e+00 : f32
      %46 = vector.broadcast %cst_35 : f32 to vector<1x4x1xf32>
      %c0_36 = arith.constant 0 : index
      %c0_37 = arith.constant 0 : index
      %c0_38 = arith.constant 0 : index
      %47 = vector.load %arg7[%c0_36, %c0_37, %c0_38] : memref<1x4x1xf32, #tpu.memory_space<vmem>>, vector<1x4x1xf32>
      tpu.vector_store %arg7[%c0_36, %c0_37, %c0_38], %46 {strides = array<i32>} : memref<1x4x1xf32, #tpu.memory_space<vmem>>, vector<1x4x1xf32>,
      %cst_39 = arith.constant 0.000000e+00 : f32
      %48 = vector.broadcast %cst_39 : f32 to vector<1x32x1xf32>
      %c0_40 = arith.constant 0 : index
      %c0_41 = arith.constant 0 : index
      %c0_42 = arith.constant 0 : index
      %49 = vector.load %arg8[%c0_40, %c0_41, %c0_42] : memref<1x32x1xf32, #tpu.memory_space<vmem>>, vector<1x32x1xf32>
      tpu.vector_store %arg8[%c0_40, %c0_41, %c0_42], %48 {strides = array<i32>} : memref<1x32x1xf32, #tpu.memory_space<vmem>>, vector<1x32x1xf32>,
      %cst_43 = arith.constant 0.000000e+00 : f32
      %50 = vector.broadcast %cst_43 : f32 to vector<1x4x32xf32>
      %c0_44 = arith.constant 0 : index
      %c0_45 = arith.constant 0 : index
      %c0_46 = arith.constant 0 : index
      %51 = vector.load %arg9[%c0_44, %c0_45, %c0_46] : memref<1x4x32xf32, #tpu.memory_space<vmem>>, vector<1x4x32xf32>
      tpu.vector_store %arg9[%c0_44, %c0_45, %c0_46], %50 {strides = array<i32>} : memref<1x4x32xf32, #tpu.memory_space<vmem>>, vector<1x4x32xf32>,
    } else {
    }
    %c0 = arith.constant 0 : index
    %c0_1 = arith.constant 0 : index
    %c0_2 = arith.constant 0 : index
    %3 = vector.load %arg2[%c0, %c0_1, %c0_2] : memref<1x32x256xbf16, #tpu.memory_space<vmem>>, vector<1x32x256xbf16>
    %4 = vector.shape_cast %3 : vector<1x32x256xbf16> to vector<32x256xbf16>
    %c0_3 = arith.constant 0 : index
    %c0_4 = arith.constant 0 : index
    %5 = vector.load %arg5[%c0_3, %c0_4] : memref<32x32xbf16, #tpu.memory_space<vmem>>, vector<32x32xbf16>
    %cst = arith.constant dense<0.000000e+00> : vector<32x256xf32>
    %6 = tpu.matmul %5, %4, %cst {dimension_numbers = #tpu.dot_dimension_numbers<[1], [0], [0], [1], [0, 0, 1, 1], [], []>} : vector<32x32xbf16>, vector<32x256xbf16>, vector<32x256xf32> -> vector<32x256xf32>
    %c0_5 = arith.constant 0 : index
    %c0_6 = arith.constant 0 : index
    %7 = vector.load %arg6[%c0_5, %c0_6] : memref<32x1xf32, #tpu.memory_space<vmem>>, vector<32x1xf32>
    %8 = vector.broadcast %7 : vector<32x1xf32> to vector<32x256xf32>
    %9 = arith.addf %6, %8 : vector<32x256xf32>
    %c0_7 = arith.constant 0 : index
    %c0_8 = arith.constant 0 : index
    %10 = vector.load %arg3[%c0_7, %c0_8] : memref<4x32xbf16, #tpu.memory_space<vmem>>, vector<4x32xbf16>
    %cst_9 = arith.constant dense<0.000000e+00> : vector<4x256xf32>
    %11 = tpu.matmul %10, %4, %cst_9 {dimension_numbers = #tpu.dot_dimension_numbers<[1], [0], [0], [1], [0, 0, 1, 1], [], []>} : vector<4x32xbf16>, vector<32x256xbf16>, vector<4x256xf32> -> vector<4x256xf32>
    %c0_10 = arith.constant 0 : index
    %c0_11 = arith.constant 0 : index
    %12 = vector.load %arg4[%c0_10, %c0_11] : memref<4x1xf32, #tpu.memory_space<vmem>>, vector<4x1xf32>
    %13 = vector.broadcast %12 : vector<4x1xf32> to vector<4x256xf32>
    %14 = arith.addf %11, %13 : vector<4x256xf32>
    %15 = arith.mulf %14, %14 : vector<4x256xf32>
    %cst_12 = arith.constant dense<0.000000e+00> : vector<256xf32>
    %16 = vector.multi_reduction <add>, %15, %cst_12 [0] : vector<4x256xf32> to vector<256xf32>
    %17 = vector.shape_cast %16 : vector<256xf32> to vector<1x256xf32>
    %cst_13 = arith.constant 9.99999996E-13 : f32
    %18 = vector.broadcast %cst_13 : f32 to vector<1x256xf32>
    %19 = arith.addf %17, %18 : vector<1x256xf32>
    %20 = math.rsqrt %19 : vector<1x256xf32>
    %21 = vector.broadcast %20 : vector<1x256xf32> to vector<4x256xf32>
    %22 = arith.mulf %14, %21 : vector<4x256xf32>
    %c0_14 = arith.constant 0 : index
    %c0_15 = arith.constant 0 : index
    %c0_16 = arith.constant 0 : index
    %23 = vector.load %arg8[%c0_14, %c0_15, %c0_16] : memref<1x32x1xf32, #tpu.memory_space<vmem>>, vector<1x32x1xf32>
    %24 = vector.shape_cast %23 : vector<1x32x1xf32> to vector<32x1xf32>
    %cst_17 = arith.constant dense<0.000000e+00> : vector<32xf32>
    %25 = vector.multi_reduction <add>, %9, %cst_17 [1] : vector<32x256xf32> to vector<32xf32>
    %26 = vector.shape_cast %25 : vector<32xf32> to vector<32x1xf32>
    %27 = arith.addf %24, %26 : vector<32x1xf32>
    %c0_18 = arith.constant 0 : index
    %c0_19 = arith.constant 0 : index
    %c0_20 = arith.constant 0 : index
    %28 = vector.load %arg8[%c0_18, %c0_19, %c0_20] : memref<1x32x1xf32, #tpu.memory_space<vmem>>, vector<1x32x1xf32>
    %29 = vector.shape_cast %28 : vector<1x32x1xf32> to vector<32x1xf32>
    %30 = vector.shape_cast %27 : vector<32x1xf32> to vector<1x32x1xf32>
    tpu.vector_store %arg8[%c0_18, %c0_19, %c0_20], %30 {strides = array<i32>} : memref<1x32x1xf32, #tpu.memory_space<vmem>>, vector<1x32x1xf32>,
    %c0_21 = arith.constant 0 : index
    %c0_22 = arith.constant 0 : index
    %c0_23 = arith.constant 0 : index
    %31 = vector.load %arg7[%c0_21, %c0_22, %c0_23] : memref<1x4x1xf32, #tpu.memory_space<vmem>>, vector<1x4x1xf32>
    %32 = vector.shape_cast %31 : vector<1x4x1xf32> to vector<4x1xf32>
    %cst_24 = arith.constant dense<0.000000e+00> : vector<4xf32>
    %33 = vector.multi_reduction <add>, %22, %cst_24 [1] : vector<4x256xf32> to vector<4xf32>
    %34 = vector.shape_cast %33 : vector<4xf32> to vector<4x1xf32>
    %35 = arith.addf %32, %34 : vector<4x1xf32>
    %c0_25 = arith.constant 0 : index
    %c0_26 = arith.constant 0 : index
    %c0_27 = arith.constant 0 : index
    %36 = vector.load %arg7[%c0_25, %c0_26, %c0_27] : memref<1x4x1xf32, #tpu.memory_space<vmem>>, vector<1x4x1xf32>
    %37 = vector.shape_cast %36 : vector<1x4x1xf32> to vector<4x1xf32>
    %38 = vector.shape_cast %35 : vector<4x1xf32> to vector<1x4x1xf32>
    tpu.vector_store %arg7[%c0_25, %c0_26, %c0_27], %38 {strides = array<i32>} : memref<1x4x1xf32, #tpu.memory_space<vmem>>, vector<1x4x1xf32>,
    %c0_28 = arith.constant 0 : index
    %c0_29 = arith.constant 0 : index
    %c0_30 = arith.constant 0 : index
    %39 = vector.load %arg9[%c0_28, %c0_29, %c0_30] : memref<1x4x32xf32, #tpu.memory_space<vmem>>, vector<1x4x32xf32>
    %40 = vector.shape_cast %39 : vector<1x4x32xf32> to vector<4x32xf32>
    %cst_31 = arith.constant dense<0.000000e+00> : vector<4x32xf32>
    %41 = tpu.matmul %22, %9, %cst_31 {dimension_numbers = #tpu.dot_dimension_numbers<[1], [1], [0], [0], [0, 0, 1, 0], [], []>} : vector<4x256xf32>, vector<32x256xf32>, vector<4x32xf32> -> vector<4x32xf32>
    %42 = arith.addf %40, %41 : vector<4x32xf32>
    %c0_32 = arith.constant 0 : index
    %c0_33 = arith.constant 0 : index
    %c0_34 = arith.constant 0 : index
    %43 = vector.load %arg9[%c0_32, %c0_33, %c0_34] : memref<1x4x32xf32, #tpu.memory_space<vmem>>, vector<1x4x32xf32>
    %44 = vector.shape_cast %43 : vector<1x4x32xf32> to vector<4x32xf32>
    %45 = vector.shape_cast %42 : vector<4x32xf32> to vector<1x4x32xf32>
    tpu.vector_store %arg9[%c0_32, %c0_33, %c0_34], %45 {strides = array<i32>} : memref<1x4x32xf32, #tpu.memory_space<vmem>>, vector<1x4x32xf32>,
    return
  }
  func.func @transform_0(%arg0: i32, %arg1: i32) -> (i32, i32, i32) {
    %c0_i32 = arith.constant 0 : i32
    %c0_i32_0 = arith.constant 0 : i32
    return %arg0, %c0_i32, %arg1 : i32, i32, i32
  }
  func.func @transform_1(%arg0: i32, %arg1: i32) -> (i32, i32) {
    %c0_i32 = arith.constant 0 : i32
    %c0_i32_0 = arith.constant 0 : i32
    %c0_i32_1 = arith.constant 0 : i32
    return %c0_i32, %c0_i32_0 : i32, i32
  }
  func.func @transform_2(%arg0: i32, %arg1: i32) -> (i32, i32) {
    %c0_i32 = arith.constant 0 : i32
    %c0_i32_0 = arith.constant 0 : i32
    %c0_i32_1 = arith.constant 0 : i32
    return %c0_i32, %c0_i32_0 : i32, i32
  }
  func.func @transform_3(%arg0: i32, %arg1: i32) -> (i32, i32) {
    %c0_i32 = arith.constant 0 : i32
    %c0_i32_0 = arith.constant 0 : i32
    %c0_i32_1 = arith.constant 0 : i32
    return %c0_i32, %c0_i32_0 : i32, i32
  }
  func.func @transform_4(%arg0: i32, %arg1: i32) -> (i32, i32) {
    %c0_i32 = arith.constant 0 : i32
    %c0_i32_0 = arith.constant 0 : i32
    %c0_i32_1 = arith.constant 0 : i32
    return %c0_i32, %c0_i32_0 : i32, i32
  }
  func.func @transform_5(%arg0: i32, %arg1: i32) -> (i32, i32, i32) {
    %c0_i32 = arith.constant 0 : i32
    %c0_i32_0 = arith.constant 0 : i32
    %c0_i32_1 = arith.constant 0 : i32
    return %arg0, %c0_i32, %c0_i32_0 : i32, i32, i32
  }
  func.func @transform_6(%arg0: i32, %arg1: i32) -> (i32, i32, i32) {
    %c0_i32 = arith.constant 0 : i32
    %c0_i32_0 = arith.constant 0 : i32
    %c0_i32_1 = arith.constant 0 : i32
    return %arg0, %c0_i32, %c0_i32_0 : i32, i32, i32
  }
  func.func @transform_7(%arg0: i32, %arg1: i32) -> (i32, i32, i32) {
    %c0_i32 = arith.constant 0 : i32
    %c0_i32_0 = arith.constant 0 : i32
    %c0_i32_1 = arith.constant 0 : i32
    return %arg0, %c0_i32, %c0_i32_0 : i32, i32, i32
  }
}

</mosaic_0001>

<bundles_post_ra>
// kernel: tpu_custom_call.1
= control target key start
LH: loop header
LB: loop body
LE: loop exit
PB: predicated region body
PF: predicated region fallthrough
CT: control target
= control target key end

     0   :  { %13 = vsyncpa [#allocation3], 0  ;;  %s1299_s0 = inlined_call_operand.hbm [shape: bf16[2,32,256], index: 0, kind: input, shape index: {}]   ;;  %s1300_s1 = inlined_call_operand.vmem [shape: bf16[4,32], index: 1, kind: input, shape index: {}]   ;;  %s1301_s2 = inlined_call_operand.vmem [shape: f32[4,1], index: 2, kind: input, shape index: {}]   ;;  %s1302_s3 = inlined_call_operand.vmem [shape: bf16[32,32], index: 3, kind: input, shape index: {}]   ;;  %s1303_s4 = inlined_call_operand.vmem [shape: f32[32,1], index: 4, kind: input, shape index: {}]   ;;  %s1304_s5 = inlined_call_operand.vmem [shape: f32[2,4,1], index: 5, kind: output, shape index: {0}]   ;;  %s1305_s6 = inlined_call_operand.vmem [shape: f32[2,32,1], index: 6, kind: output, shape index: {1}]   ;;  %s1306_s7 = inlined_call_operand.hbm [shape: f32[2,4,32], index: 7, kind: output, shape index: {2}]  }
   0x1   :  { %15 = vsyncpa [#allocation3 + $0x1], 0 }
   0x2   :  { %16 = vsyncpa [#allocation4], 0 }
   0x3   :  { %18 = vsyncpa [#allocation4 + $0x1], 0  ;;  %s1078_s24 = smov 0   ;;  %s1080_s25 = smov 0  }
   0x4   :  { %s1082_s26 = smov 0   ;;  %s1084_s27 = smov 0  }
   0x5   :  { %s1086_s28 = smov 0   ;;  %s1088_s29 = smov 0  }
   0x6 LB: > { %s814_s30 = sadd.s32 4294967295, %s1030_s29   ;;  %s815_s8 = sadd.s32 4294967294, %s1030_s29   ;;  %s1030_s29 = sphi %s1088_s29, %s24_s29   ;;  %s1026_s28 = sphi %s1086_s28, %s1320_s28   ;;  %s1022_s27 = sphi %s1084_s27, %s1319_s27   ;;  %s1018_s26 = sphi %s1082_s26, %s1318_s26   ;;  %s1014_s25 = sphi %s1080_s25, %s1317_s25   ;;  %s1010_s24 = sphi %s1078_s24, %s1316_s24  }
   0x7   : > { %s36_s9 = sadd.s32 1, %s1026_s28  ;;  %s45_s10 = sadd.s32 1, %s1018_s26 }
   0x8   : > { %p38_p0 = scmp.ge.s32.totalorder %s36_s9, 2  ;;  %p52_p1 = scmp.ne.s32.totalorder %s1018_s26, %s1014_s25 }
   0x9   : > { %p53_p2 = scmp.eq.s32.totalorder %s1030_s29, 0  ;;  %p58_p3 = scmp.ne.s32.totalorder %s1014_s25, %s1010_s24 }
   0xa   : > { %s1322_s9 = smov (%p38_p0, %s36_s9), 0  ;;  %p59_p5 = scmp.eq.s32.totalorder %s814_s30, 0 }
   0xb   : > { %1308 = sst [smem:[#allocation8_spill]] %s1322_s9  ;;  %p1119_p4 = por %p53_p2, %p52_p1 }
   0xc   : > { %s40_s12 = ssub.s32 %s1026_s28, %s1322_s9  ;;  %p218_p6 = scmp.eq.s32.totalorder %s814_s30, 1 }
   0xd   : > { %p43_p7 = scmp.eq.s32.totalorder %s40_s12, 0  ;;  %p1125_p8 = por %p59_p5, %p58_p3 }
   0xe   : > { %p1129_p9 = por %p218_p6, %p52_p1  ;;  %p224_p10 = scmp.eq.s32.totalorder %s815_s8, 1 }
   0xf   : > { %s1134_s15 = scalar_select %p43_p7, %s1018_s26, %s45_s10  }
  0x10   : > { %p1136_p11 = por %p224_p10, %p58_p3  ;;  %p854_p13 = scmp.lt.s32.totalorder %s1030_s29, 2 }
  0x11   : > { %s256_s17 = sand.u32 1, %s1018_s26   ;;  %s840_s19 = sshll.u32 %s1026_s28, 9 }
  0x12   : > { %s818_s18 = sshll.u32 %s256_s17, 5  ;;  %s268_s22 = scalar_lea.hbm %s1299_s0, %s840_s19 }
  0x13   : > { %s260_s23 = scalar_lea.vmem [#allocation2], %s818_s18  ;;  %p1149_p0 = pnand %p854_p13, %p1119_p4 }
  0x14   : > { %s269_s30 = sshll.u32 %s260_s23, 4  ;;  %p821_p1 = scmp.ge.s32.totalorder %s1030_s29, 1  ;;  %s270_s30 = int_to_ptr.vmem [resolvable:$true] %s269_s30 }
  0x15   : > { %s257_s10 = scalar_lea.sflag [#allocation3], %s256_s17  ;;  %p924_p2 = pneg %p1149_p0 }
  0x16   : > { %s935_s12 = scalar_lea.vmem %s270_s30, 512  ;;  %s1032_s9 = smov [#allocation2]  }
  0x17   : > { %p936_p3 = scmp.ne.s32.totalorder %s270_s30, %s935_s12  ;;  %s940_s20 = sshll.u32 %s1032_s9, 4  ;;  %s941_s20 = int_to_ptr.vmem [resolvable:$false] %s940_s20 }
  0x18   : > { %s942_s18 = scalar_lea.vmem %s941_s20, 1024  ;;  %p943_p7 = scmp.lt.s32.totalorder %s270_s30, %s941_s20 }
  0x19   : > { %p938_p5 = pnand %p936_p3, %p924_p2  ;;  %p944_p10 = scmp.lt.s32.totalorder %s942_s18, %s935_s12 }
  0x1b   : > { %p939_p6 = pneg %p938_p5  ;;  %p945_p12 = por %p944_p10, %p943_p7 }
  0x1d   : > { %p946_p4 = pnand %p945_p12, %p939_p6 }
  0x1f   : > { %949 = shalt.err (!%p946_p4)
}
  0x20   : > { %s1033_s11 = smov 128   ;;  %s1034_s17 = smov 8  }
  0x21   : > { %849 = dma.hbm_to_vmem [thread:$0]  (!%p1149_p0), %s268_s22, 512, %s270_s30, %s257_s10, %s1033_s11, %s1033_s11, %s1034_s17  }
  0x22   : > { %p277_p13 = scmp.lt.s32.totalorder %s1030_s29, 3 }
  0x24   : > { %p278_p2 = pnand %p821_p1, %p277_p13 }
  0x25   : > { %s1162_s9 = sand.u32 (!%p278_p2), 1, %s1014_s25  }
  0x26   : > { %281 = sbr.rel (%p278_p2) target bundleno = 494 (0x1ee), region = 40  ;;  %s822_s19 = sshll.u32 (!%p278_p2), %s1162_s9, 5 }
  0x27   : > { %s284_s21 = scalar_lea.sflag (!%p278_p2), [#allocation3], %s1162_s9  ;;  %s287_s23 = scalar_lea.vmem (!%p278_p2), [#allocation2], %s822_s19 }
  0x2b   : > { %1001 = dma.done.wait (%p1125_p8), %s284_s21, 512  }
  0x2c   : > { %1003 = vsyncadd (%p1125_p8), %s284_s21, 4294966784  ;;  %v1035_v0 = vmov 0   ;;  %v910_v1 = vld [vmem:[%s287_s23 + $0x14] ss:$8 sps:$4 sm:$0xff]   ;;  %v912_v2 = vld [vmem:[%s287_s23 + $0x10] ss:$8 sps:$4 sm:$0xff]  }
  0x2d   : > { %452 = vmatprep.mubr.bf16.mxu0 %v1035_v0  ;;  %515 = vmatprep.mubr.bf16.mxu1 %v1035_v0  ;;  %v913_v3 = vld [vmem:[%s287_s23 + $0x4] ss:$8 sps:$4 sm:$0xff]   ;;  %v915_v4 = vld [vmem:[%s287_s23] ss:$8 sps:$4 sm:$0xff]   ;;  %v361_v6 = vld [vmem:[%s1303_s4 + $0x10] sm:$0xff]  ;;  %vm413_vm0 = vcmask 261120  }
  0x2e   : > { %908 = vset.pattern.permute.xlu0 %v1035_v0  ;;  %909 = vset.pattern.permute.xlu1 %v1035_v0  ;;  %v474_v5 = vld [vmem:[%s1301_s2] sm:$0xf]  ;;  %v362_v9 = vld [vmem:[%s1303_s4 + $0x18] sm:$0xff]  ;;  %v360_v10 = vld [vmem:[%s1303_s4 + $0x8] sm:$0xff]  ;;  %p328_p8 = scmp.lt.s32.totalorder %s1022_s27, 1  ;;  %vm344_vm1 = vcmask 7168  }
  0x2f   : > { %432 = vmatprep.subr.bf16.mxu0 %v910_v1  ;;  %495 = vmatprep.subr.bf16.mxu1 %v910_v1  ;;  %v916_v7 = vld [vmem:[%s1302_s3] sm:$0xff]   ;;  %v917_v12 = vld [vmem:[%s1302_s3 + $0x8] sm:$0xff]   ;;  %v1036_v13 = vmov 0.0   ;;  %vm526_vm2 = vcmask 1043456   ;;  %vm342_vm3 = vcmask 3072   ;;  %s823_s23 = sshll.u32 %s1162_s9, 2 }
  0x30   : > { %433 = vmatpush1.bf16.msra.mxu0 %v912_v2  ;;  %496 = vmatpush1.bf16.msra.mxu1 %v912_v2  ;;  %v473_v8 = vld [vmem:[%s1300_s1] sm:$0x3]  ;;  %s1196_s8 = scalar_select %p328_p8, %s1022_s27, 1  ;;  %vm349_vm4 = vcmask 257024  }
  0x31   : > { %434 = vmatprep.subr.bf16.mxu0 %v913_v3  ;;  %497 = vmatprep.subr.bf16.mxu1 %v913_v3  ;;  %v359_v11 = vld [vmem:[%s1303_s4] sm:$0xff]  ;;  %s326_s22 = scalar_lea.vmem [#allocation5], %s823_s23  ;;  %s837_s30 = sshll.u32 %s1022_s27, 6 }
  0x32   : > { %477 = vperm.xlu0 %908, %v474_v5   ;;  %375 = vperm.xlu1 %909, %v361_v6   ;;  %s841_s10 = sshll.u32 %s1196_s8, 5  ;;  %s824_s11 = sshll.u32 %s1196_s8, 2  ;;  %350 = vst.msk [vmem:[%s326_s22] sm:$0xf] %vm349_vm4, %v1036_v13 }
  0x33   : > { %s1202_s18 = scalar_lea.vmem %s1305_s6, %s841_s10  ;;  %s1226_s21 = scalar_lea.vmem %s1304_s5, %s824_s11 }
  0x34   : > { %435 = vmatpush1.bf16.msra.mxu0 %v915_v4  ;;  %498 = vmatpush1.bf16.msra.mxu1 %v915_v4  ;;  %345 = vst.msk [vmem:[%s1202_s18] sm:$0xff] %vm344_vm1, %v1036_v13  ;;  %346 = vst.msk [vmem:[%s1202_s18 + $0x8] sm:$0xff] %vm344_vm1, %v1036_v13  ;;  %s684_s13 = sshll.u32 %s326_s22, 4  ;;  %s1256_s12 = scalar_lea.hbm %s1306_s7, %s837_s30  ;;  %s685_s13 = int_to_ptr.vmem [resolvable:$true] %s684_s13 }
  0x35   : > { %347 = vst.msk [vmem:[%s1202_s18 + $0x10] sm:$0xff] %vm344_vm1, %v1036_v13  ;;  %348 = vst.msk [vmem:[%s1202_s18 + $0x18] sm:$0xff] %vm344_vm1, %v1036_v13  ;;  %s665_s20 = scalar_lea.sflag [#allocation4], %s1162_s9  ;;  %s1037_s11 = smov [#allocation5]  }
  0x36   : > { %380 = vperm.xlu0 %908, %v362_v9   ;;  %370 = vperm.xlu1 %909, %v360_v10   ;;  %343 = vst.msk [vmem:[%s1226_s21] sm:$0xf] %vm342_vm3, %v1036_v13  ;;  %s954_s27 = sshll.u32 %s1037_s11, 4  ;;  %s955_s27 = int_to_ptr.vmem [resolvable:$false] %s954_s27 }
  0x37   : > { %833 = vmatmul.mubr.msk.bf16.vlgmr.msra.gmra.mxu0 %vm413_vm0, %v916_v7  ;;  %835 = vmatmul.mubr.msk.bf16.vlgmr.msra.gmra.mxu1 %vm413_vm0, %v473_v8  ;;  %s956_s17 = scalar_lea.vmem %s955_s27, 128  ;;  %p957_p3 = scmp.lt.s32.totalorder %s685_s13, %s955_s27 }
  0x38   : > { %462 = vmatprep.mubr.bf16.mxu0 %v1035_v0 }
  0x3a   : > { %365 = vperm.xlu0 %908, %v359_v11  }
  0x3b   : > { %v547_v6 = vld [vmem:[%s1202_s18] sm:$0xff]  ;;  %v548_v9 = vld [vmem:[%s1202_s18 + $0x8] sm:$0xff] }
  0x3f   : > { %834 = vmatmul.mubr.msk.bf16.gmra.mxu0 %vm413_vm0, %v917_v12  ;;  %v549_v12 = vld [vmem:[%s1202_s18 + $0x10] sm:$0xff] }
  0xad   : > { %v478_v14 = vpop.permute.xlu0 %477  ;;  %v376_v16 = vpop.permute.xlu1 %375 }
  0xb1   : > { %v381_v15 = vpop.permute.xlu0 %380  ;;  %v371_v22 = vpop.permute.xlu1 %370 }
  0xb5   : > { %v366_v17 = vpop.permute.xlu0 %365 }
  0xf7   : > { %v454_v18 = vpop.f32.mrf.mxu0  ;;  %v517_v19 = vpop.f32.mrf.mxu1 }
  0xf8   : > { %v1216_v20 = vadd.f32 %v517_v19, %v478_v14  ;;  %v455_v21 = vadd.f32 %v454_v18, %v366_v17  ;;  %v572_v18 = vld [vmem:[%s1226_s21] sm:$0xf] }
  0xf9   : > { %v456_v23 = vpop.f32.mrf.mxu0  ;;  %v519_v24 = vpop.f32.mrf.mxu1 }
  0xfa   : > { %v524_v25 = vmul.f32 %v1216_v20, %v1216_v20  ;;  %v457_v26 = vadd.f32 %v456_v23, %v366_v17  ;;  %v520_v27 = vadd.f32 %v519_v24, %v478_v14 }
  0xfb   : > { %v458_v28 = vpop.f32.mrf.mxu0  ;;  %v521_v29 = vpop.f32.mrf.mxu1 }
  0xfc   : > { %v527_v30 = vsel %vm526_vm2, %v524_v25, 0.0  ;;  %v525_v31 = vmul.f32 %v520_v27, %v520_v27  ;;  %v459_v32 = vadd.f32 %v458_v28, %v371_v22  ;;  %v551_v33 = vadd.f32 %v457_v26, %v455_v21 }
  0xfd   : > { %v528_v34 = vrot.slane %v527_v30, 4  ;;  %v460_v35 = vpop.f32.mrf.mxu0  ;;  %v522_v36 = vpop.f32.mrf.mxu1 }
  0xfe   : > { %v534_v37 = vsel %vm526_vm2, %v525_v31, 0.0  ;;  %v461_v38 = vadd.f32 %v460_v35, %v371_v22  ;;  %552 = vadd.xlane.f32.xlu1 %v551_v33 }
  0xff   : > { %v529_v39 = vadd.f32 %v528_v34, %v527_v30  ;;  %v535_v40 = vrot.slane %v534_v37, 4  ;;  %v464_v41 = vpop.f32.mrf.mxu0 }
 0x100   : > { %v465_v42 = vadd.f32 %v464_v41, %v376_v16  ;;  %v554_v43 = vadd.f32 %v461_v38, %v459_v32 }
 0x101   : > { %v530_v44 = vrot.slane %v529_v39, 2  ;;  %v536_v45 = vadd.f32 %v535_v40, %v534_v37  ;;  %v466_v46 = vpop.f32.mrf.mxu0 }
 0x102   : > { %v467_v47 = vadd.f32 %v466_v46, %v376_v16  ;;  %555 = vadd.xlane.f32.xlu0 %v554_v43  ;;  %v550_v16 = vld [vmem:[%s1202_s18 + $0x18] sm:$0xff] }
 0x103   : > { %v531_v48 = vadd.f32 %v530_v44, %v529_v39  ;;  %v537_v49 = vrot.slane %v536_v45, 2  ;;  %v468_v50 = vpop.f32.mrf.mxu0 }
 0x104   : > { %v557_v51 = vadd.f32 %v467_v47, %v465_v42  ;;  %v469_v55 = vadd.f32 %v468_v50, %v381_v15 }
 0x105   : > { %v532_v52 = vrot.slane %v531_v48, 1  ;;  %v538_v53 = vadd.f32 %v537_v49, %v536_v45  ;;  %v470_v54 = vpop.f32.mrf.mxu0 }
 0x106   : > { %v471_v56 = vadd.f32 %v470_v54, %v381_v15  ;;  %558 = vadd.xlane.f32.xlu0 %v557_v51 }
 0x107   : > { %v533_v57 = vadd.f32 %v532_v52, %v531_v48  ;;  %v539_v58 = vrot.slane %v538_v53, 1 }
 0x108   : > { %606 = vmatprep.subr.mxu0 %v471_v56  ;;  %v560_v59 = vadd.f32 %v471_v56, %v469_v55 }
 0x109   : > { %v541_v60 = vadd.f32 1e-12, %v533_v57  ;;  %v540_v61 = vadd.f32 %v539_v58, %v538_v53  ;;  %607 = vmatpush1.xpose.msra.mxu0 %v469_v55 }
 0x10a   : > { %608 = vmatprep.subr.mxu0 %v467_v47  ;;  %561 = vadd.xlane.f32.xlu1 %v560_v59 }
 0x10b   : > { %918 = vrsqrt.f32 %v541_v60  ;;  %v542_v62 = vadd.f32 1e-12, %v540_v61 }
 0x10d   : > { %920 = vrsqrt.f32 %v542_v62  ;;  %609 = vmatpush1.xpose.msra.mxu0 %v465_v42 }
 0x10e   : > { %610 = vmatprep.subr.mxu0 %v461_v38 }
 0x111   : > { %611 = vmatpush1.xpose.msra.mxu0 %v459_v32 }
 0x112   : > { %612 = vmatprep.subr.mxu0 %v457_v26 }
 0x115   : > { %613 = vmatpush1.xpose.msra.mxu0 %v455_v21  ;;  %v581_v21 = vld [vmem:[%s326_s22] sm:$0xf] }
 0x118   : > { %v919_v63 = vpop.eup %918 }
 0x119   : > { %v545_v0 = vmul.f32 %v919_v63, %v1216_v20 }
 0x11a   : > { %v921_v1 = vpop.eup %920 }
 0x11b   : > { %v546_v2 = vmul.f32 %v921_v1, %v520_v27  ;;  %v573_v3 = vsel %vm526_vm2, %v545_v0, 0.0 }
 0x11d   : > { %646 = vmatprep.mubr.f32.mxu0 %v546_v2  ;;  %v574_v4 = vsel %vm526_vm2, %v546_v2, 0.0 }
 0x11e   : > { %647 = vmatmul.mubr.f32.vlgmr.msra.gmra.mxu0 %v545_v0  ;;  %v575_v5 = vadd.f32 %v574_v4, %v573_v3 }
 0x120   : > { %576 = vadd.xlane.f32.xlu0 %v575_v5 }
 0x187   : > { %v553_v7 = vpop.xlane.xlu1 %552 }
 0x188   : > { %v563_v8 = vadd.f32 %v553_v7, %v547_v6 }
 0x18a   : > { %568 = vst.msk [vmem:[%s1202_s18] sm:$0xff] %vm344_vm1, %v563_v8 }
 0x18b   : > { %v556_v10 = vpop.xlane.xlu0 %555 }
 0x18c   : > { %v564_v11 = vadd.f32 %v556_v10, %v548_v9 }
 0x18e   : > { %569 = vst.msk [vmem:[%s1202_s18 + $0x8] sm:$0xff] %vm344_vm1, %v564_v11 }
 0x18f   : > { %v559_v14 = vpop.xlane.xlu0 %558 }
 0x190   : > { %v565_v15 = vadd.f32 %v559_v14, %v549_v12 }
 0x192   : > { %570 = vst.msk [vmem:[%s1202_s18 + $0x10] sm:$0xff] %vm344_vm1, %v565_v15 }
 0x193   : > { %v562_v13 = vpop.xlane.xlu1 %561 }
 0x194   : > { %v566_v17 = vadd.f32 %v562_v13, %v550_v16 }
 0x196   : > { %571 = vst.msk [vmem:[%s1202_s18 + $0x18] sm:$0xff] %vm344_vm1, %v566_v17  ;;  %s950_s18 = scalar_lea.vmem %s685_s13, 64 }
 0x197   : > { %p951_p12 = scmp.ne.s32.totalorder %s685_s13, %s950_s18  ;;  %p958_p5 = scmp.lt.s32.totalorder %s956_s17, %s950_s18 }
 0x199   : > { %p952_p0 = pnand %p951_p12, %p1129_p9  ;;  %p959_p6 = por %p958_p5, %p957_p3 }
 0x19b   : > { %p953_p1 = pneg %p952_p0 }
 0x19d   : > { %p960_p7 = pnand %p959_p6, %p953_p1 }
 0x1a9   : > { %v577_v19 = vpop.xlane.xlu0 %576 }
 0x1aa   : > { %v578_v20 = vadd.f32 %v577_v19, %v572_v18 }
 0x1ac   : > { %580 = vst.msk [vmem:[%s1226_s21] sm:$0xf] %vm342_vm3, %v578_v20 }
 0x1de   : > { %v648_v22 = vpop.f32.mrf.mxu0 }
 0x1df   : > { %v652_v23 = vadd.f32 %v648_v22, %v581_v21 }
 0x1e0   : > { %v650_v24 = vpop.f32.mrf.mxu0 }
 0x1e1   : > { %654 = vst.msk [vmem:[%s326_s22] sm:$0xf] %vm349_vm4, %v652_v23 }
 0x1e2   : > { %963 = shalt.err (!%p960_p7)
}
 0x1e3   : > { %s964_s19 = scalar_lea.hbm %s1256_s12, 64  ;;  %s968_s23 = scalar_lea.hbm %s1306_s7, 128 }
 0x1e4   : > { %p965_p10 = scmp.ne.s32.totalorder %s1256_s12, %s964_s19  ;;  %p969_p2 = scmp.lt.s32.totalorder %s1256_s12, %s1306_s7 }
 0x1e5   : > { %p970_p8 = scmp.lt.s32.totalorder %s968_s23, %s964_s19 }
 0x1e6   : > { %p966_p4 = pnand %p965_p10, %p1129_p9 }
 0x1e7   : > { %p971_p12 = por %p970_p8, %p969_p2 }
 0x1e8   : > { %p967_p13 = pneg %p966_p4 }
 0x1ea   : > { %p972_p0 = pnand %p971_p12, %p967_p13 }
 0x1ec   : > { %975 = shalt.err (!%p972_p0)
}
 0x1ed   : > { %844 = dma.vmem_to_hbm [thread:$0]  (%p1129_p9), %s685_s13, 64, %s1256_s12, %s665_s20  }
 0x1ee PF: > { %s711_s8 = sand.u32 1, %s1010_s24   ;;  %p1314_p1 = scmp.ge.s32.totalorder %s1030_s29, 2 }
 0x1ef   : > { %s712_s10 = scalar_lea.sflag [#allocation4], %s711_s8 }
 0x1f0   : > { %p851_p3 = pnand %p1314_p1, %p1136_p11 }
 0x1f2   : > { %p852_p5 = pneg %p851_p3 }
 0x1f4   : > { %1005 = dma.done.wait (%p852_p5), %s712_s10, 64  }
 0x1f5   : > { %1007 = vsyncadd (%p852_p5), %s712_s10, 4294967232  ;;  %s24_s29 = sadd.s32 1, %s1030_s29   ;;  %s1315_s14 = sld [smem:[#allocation8_spill]] }
 0x1f6   : > { %p21_p6 = scmp.ge.s32.totalorder %s24_s29, 4   ;;  %s1316_s24 = smov %s1014_s25 }
 0x1f7   : > { %s1317_s25 = smov %s1018_s26  ;;  %s1318_s26 = smov %s1134_s15 }
 0x1f8   : > { %s1319_s27 = smov %s1026_s28  ;;  %23 = sbr.rel (!%p21_p6) target bundleno = 6 (0x6), region = 113 }
 0x1fb   : > { %s1320_s28 = smov %s1315_s14 }
 0x1fd   :  { %717 = vsyncpa [#allocation3], 1 }
 0x1fe   :  { %719 = vsyncpa [#allocation3 + $0x1], 1 }
 0x1ff   :  { %720 = vsyncpa [#allocation4], 1 }
 0x200   :  { %722 = vsyncpa [#allocation4 + $0x1], 1 }

</bundles_post_ra>
